<compile_context>
chip_gen: v7x
topology: tpu7x:2x2x1
jax: 0.10.0
libtpu: 0.0.40
codegen_flags: <defaults>
</compile_context>

<pallas_src>
import numpy as np
import jax
import jax.numpy as jnp
from jax import lax
from jax.experimental import pallas as pl
from jax.experimental.pallas import tpu as pltpu

H = W = 28
C1_K, C1_S = 5, 5            # conv1: 1->1 ch, 5x5 kernel, stride 5 => 5x5 map
C2_K = 2                     # conv2: 1->1 ch, 2x2 kernel, stride 1 => 4x4 map
C3_K = 4                     # conv3: 1->10 ch, 4x4 kernel          => 1x1 map
O1 = (H - C1_K) // C1_S + 1  # 5
O2 = O1 - C2_K + 1           # 4
NCLS = 10
P1 = O1 * O1                 # 25
P2 = O2 * O2                 # 16

# Batch tile.  2048 rows * 784 * 4 B ~= 6.3 MiB per input buffer (x2 for
# double buffering) -- past the per-step-overhead knee on all generations and
# well inside physical VMEM everywhere (vmem_limit_bytes is raised to match,
# since this exceeds v5e's 16 MiB scoped default).
DEFAULT_TILE_N = 2048
_LANE = 128


def convnn_kernel(x_ref, w1_ref, b1_ref, w2_ref, b2_ref, w3_ref, b3_ref, out_ref):
    """x_ref: (TN, 784); w1:(784,25) b1:(1,25) w2:(25,16) b2:(1,16)
    w3:(16,10) b3:(1,10); out_ref: (TN, 10).  Accumulation in f32."""
    x = x_ref[...]
    # conv1 + ReLU as one MXU matmul (stride == kernel => disjoint patches).
    y1 = jnp.maximum(
        jnp.dot(x, w1_ref[...], preferred_element_type=jnp.float32) + b1_ref[...],
        0.0)                                                     # (TN, 25)
    # conv2 + ReLU as a second matmul.
    y2 = jnp.maximum(
        jnp.dot(y1, w2_ref[...], preferred_element_type=jnp.float32) + b2_ref[...],
        0.0)                                                     # (TN, 16)
    # conv3 (4x4 kernel over the whole 4x4 map, 10 out channels) == matmul.
    out = jnp.dot(y2, w3_ref[...], preferred_element_type=jnp.float32) + b3_ref[...]
    out_ref[...] = out.astype(out_ref.dtype)                     # (TN, 10)


def fold_params(params, dtype=jnp.float32):
    """Fold conv1/conv2/conv3 into dense matmul weights.

    Call ONCE per parameter set (hoisted out of the forward path; pure numpy,
    no device scatters).  `dtype` controls the matmul-weight dtype — pass
    jnp.bfloat16 if the pixel producer also emits bf16 images (halves the
    HBM read that bounds this kernel).  Biases stay f32 (added post-matmul).
    """
    w1, b1, w2, b2, w3, b3 = (np.asarray(p, np.float32) for p in params)
    w1k = w1.reshape(C1_K, C1_K)
    w2k = w2.reshape(C2_K, C2_K)

    # conv1 -> W1big (784, 25): column p=oi*5+oj has w1[ki,kj] at row
    # (oi*5+ki)*28 + (oj*5+kj).  Valid because stride == kernel size.
    w1_big = np.zeros((H * W, P1), np.float32)
    for oi in range(O1):
        for oj in range(O1):
            col = oi * O1 + oj
            for ki in range(C1_K):
                for kj in range(C1_K):
                    w1_big[(oi * C1_S + ki) * W + (oj * C1_S + kj), col] = w1k[ki, kj]

    # conv2 -> W2big (25, 16): column q=oi*4+oj has w2[di,dj] at row
    # (oi+di)*5 + (oj+dj).
    w2_big = np.zeros((P1, P2), np.float32)
    for oi in range(O2):
        for oj in range(O2):
            col = oi * O2 + oj
            for di in range(C2_K):
                for dj in range(C2_K):
                    w2_big[(oi + di) * O1 + (oj + dj), col] = w2k[di, dj]

    # conv3 -> (16, 10): row index kh*4+kw, col index = out channel.
    w3_mat = w3.reshape(NCLS, C3_K * C3_K).T

    return (jnp.asarray(w1_big, dtype),
            jnp.asarray(np.broadcast_to(b1.reshape(1, 1), (1, P1)), jnp.float32),
            jnp.asarray(w2_big, dtype),
            jnp.asarray(np.broadcast_to(b2.reshape(1, 1), (1, P2)), jnp.float32),
            jnp.asarray(w3_mat, dtype),
            jnp.asarray(b3.reshape(1, NCLS), jnp.float32))


def _round_up(a, m):
    return (a + m - 1) // m * m


def _pick_tiling(n, tile_n):
    """Choose (tile rows, padded batch, grid len).

    Keeps the grid length >= 2 and even (v7x shards the "parallel" axis across
    its 2 TensorCores), keeps tiles a multiple of 8 rows (f32 sublane tile),
    and picks the tile count so row-padding waste stays at most a few rows.
    """
    g = max(2, pl.cdiv(n, tile_n))
    if g % 2:
        g += 1
    tn = max(8, _round_up(pl.cdiv(n, g), 8))
    n_pad = g * tn
    return tn, n_pad, g


def _vmem_limit_bytes(tn, in_itemsize):
    """Scoped-VMEM budget for the chosen tile (double-buffered x & out,
    resident weights, lane-padded intermediates) with ~1.5x headroom.
    Floor 32 MiB; cap 56 MiB so it stays under v7x's 64 MiB physical VMEM."""
    x_blk = tn * _round_up(H * W, _LANE) * in_itemsize           # per buffer
    out_blk = tn * _LANE * 4                                     # per buffer
    mids = 2 * tn * _LANE * 4                                    # y1, y2 temporaries
    wts = (_round_up(H * W, 8) * _LANE + 32 * _LANE + 16 * _LANE
           + 3 * 8 * _LANE) * 4
    need = 2 * x_blk + 2 * out_blk + mids + 2 * wts
    return int(min(max(need * 3 // 2 + (6 << 20), 32 << 20), 56 << 20))


def convnn_forward(x_nchw, folded_params, *, tile_n=DEFAULT_TILE_N):
    """x_nchw: (N,1,28,28) f32 (or bf16 if folded_params were built in bf16).
    folded_params: output of fold_params() (built once, reused every call)."""
    w1_big, b1_row, w2_big, b2_row, w3_mat, b3_row = folded_params

    n = x_nchw.shape[0]
    x2d = x_nchw.reshape(n, H * W)          # free reshape (contiguous), no cast here

    tn, n_pad, grid = _pick_tiling(n, tile_n)
    if n_pad != n:
        # Only hit for ragged batches (and the tiny demo batch); pad rows are
        # sliced off below.  For large aligned batches n_pad == n (no copy).
        x2d = jnp.pad(x2d, ((0, n_pad - n), (0, 0)))

    const = lambda i: (0, 0)          # weights resident in VMEM across grid steps
    out = pl.pallas_call(
        convnn_kernel,
        out_shape=jax.ShapeDtypeStruct((n_pad, NCLS), jnp.float32),
        grid=(grid,),
        in_specs=[
            pl.BlockSpec((tn, H * W), lambda i: (i, 0)),   # x: tiled over batch
            pl.BlockSpec((H * W, P1), const),              # W1big
            pl.BlockSpec((1, P1), const),                  # b1
            pl.BlockSpec((P1, P2), const),                 # W2big
            pl.BlockSpec((1, P2), const),                  # b2
            pl.BlockSpec((P2, NCLS), const),               # W3
            pl.BlockSpec((1, NCLS), const),                # b3
        ],
        out_specs=pl.BlockSpec((tn, NCLS), lambda i: (i, 0)),
        compiler_params=pltpu.CompilerParams(
            dimension_semantics=("parallel",),             # megacore sharding on v7x
            vmem_limit_bytes=_vmem_limit_bytes(tn, x2d.dtype.itemsize),
        ),
    )(x2d, w1_big, b1_row, w2_big, b2_row, w3_mat, b3_row)
    return out[:n]


def ref_forward(x, params):
    """Pure-JAX reference matching the PyTorch module exactly."""
    w1, b1, w2, b2, w3, b3 = params
    dn = ("NCHW", "OIHW", "NCHW")
    y = lax.conv_general_dilated(x, w1, (C1_S, C1_S), "VALID", dimension_numbers=dn)
    y = jnp.maximum(y + b1.reshape(1, -1, 1, 1), 0.0)
    y = lax.conv_general_dilated(y, w2, (1, 1), "VALID", dimension_numbers=dn)
    y = jnp.maximum(y + b2.reshape(1, -1, 1, 1), 0.0)
    y = lax.conv_general_dilated(y, w3, (1, 1), "VALID", dimension_numbers=dn)
    y = y + b3.reshape(1, -1, 1, 1)
    return y.reshape(x.shape[0], -1)


def init_params(key):
    ks = jax.random.split(key, 6)
    w1 = jax.random.normal(ks[0], (1, 1, C1_K, C1_K), jnp.float32) * 0.2
    b1 = jax.random.normal(ks[1], (1,), jnp.float32) * 0.1
    w2 = jax.random.normal(ks[2], (1, 1, C2_K, C2_K), jnp.float32) * 0.5
    b2 = jax.random.normal(ks[3], (1,), jnp.float32) * 0.1
    w3 = jax.random.normal(ks[4], (NCLS, 1, C3_K, C3_K), jnp.float32) * 0.25
    b3 = jax.random.normal(ks[5], (NCLS,), jnp.float32) * 0.1
    return (w1, b1, w2, b2, w3, b3)


if __name__ == "__main__":
    key = jax.random.PRNGKey(0)
    k_params, k_x = jax.random.split(key)
    params = init_params(k_params)
    x = jax.random.normal(k_x, (2, 1, H, W), jnp.float32)   # batch=2 MNIST-sized input

    folded = fold_params(params)            # fold convs -> matmul weights ONCE
    out = convnn_forward(x, folded)         # exercises padding + 2-step grid
    out = jax.block_until_ready(out)

    ref = ref_forward(x, params)
    assert out.shape == (2, NCLS)
    assert jnp.allclose(out, ref, atol=1e-4, rtol=1e-4), (out, ref)
    print("KERNEL_OK")
</pallas_src>

<mosaic_0001>
module attributes {stable_mosaic.version = 11 : i64} {
  func.func @convnn_kernel(%arg0: i32, %arg1: memref<8x784xf32, #tpu.memory_space<vmem>>, %arg2: memref<784x25xf32, #tpu.memory_space<vmem>>, %arg3: memref<1x25xf32, #tpu.memory_space<vmem>>, %arg4: memref<25x16xf32, #tpu.memory_space<vmem>>, %arg5: memref<1x16xf32, #tpu.memory_space<vmem>>, %arg6: memref<16x10xf32, #tpu.memory_space<vmem>>, %arg7: memref<1x10xf32, #tpu.memory_space<vmem>>, %arg8: memref<8x10xf32, #tpu.memory_space<vmem>>) attributes {dimension_semantics = [#tpu.dimension_semantics<parallel>], iteration_bounds = array<i64: 2>, scalar_prefetch = 0 : i64, scratch_operands = 0 : i64, tpu.core_type = #tpu.core_type<tc>, window_params = [{transform_indices = @transform_0, window_bounds = array<i64: 8, 784>}, {pipeline_mode = #tpu.pipeline_mode<synchronous>, transform_indices = @transform_1, window_bounds = array<i64: 784, 25>}, {pipeline_mode = #tpu.pipeline_mode<synchronous>, transform_indices = @transform_2, window_bounds = array<i64: 1, 25>}, {pipeline_mode = #tpu.pipeline_mode<synchronous>, transform_indices = @transform_3, window_bounds = array<i64: 25, 16>}, {pipeline_mode = #tpu.pipeline_mode<synchronous>, transform_indices = @transform_4, window_bounds = array<i64: 1, 16>}, {pipeline_mode = #tpu.pipeline_mode<synchronous>, transform_indices = @transform_5, window_bounds = array<i64: 16, 10>}, {pipeline_mode = #tpu.pipeline_mode<synchronous>, transform_indices = @transform_6, window_bounds = array<i64: 1, 10>}, {transform_indices = @transform_7, window_bounds = array<i64: 8, 10>}]} {
    %c0 = arith.constant 0 : index
    %c0_0 = arith.constant 0 : index
    %0 = vector.load %arg1[%c0, %c0_0] : memref<8x784xf32, #tpu.memory_space<vmem>>, vector<8x784xf32>
    %c0_1 = arith.constant 0 : index
    %c0_2 = arith.constant 0 : index
    %1 = vector.load %arg2[%c0_1, %c0_2] : memref<784x25xf32, #tpu.memory_space<vmem>>, vector<784x25xf32>
    %cst = arith.constant dense<0.000000e+00> : vector<8x25xf32>
    %2 = tpu.matmul %0, %1, %cst {dimension_numbers = #tpu.dot_dimension_numbers<[1], [0], [0], [1], [0, 0, 1, 1], [], []>} : vector<8x784xf32>, vector<784x25xf32>, vector<8x25xf32> -> vector<8x25xf32>
    %c0_3 = arith.constant 0 : index
    %c0_4 = arith.constant 0 : index
    %3 = vector.load %arg3[%c0_3, %c0_4] : memref<1x25xf32, #tpu.memory_space<vmem>>, vector<1x25xf32>
    %4 = vector.broadcast %3 : vector<1x25xf32> to vector<8x25xf32>
    %5 = arith.addf %2, %4 : vector<8x25xf32>
    %cst_5 = arith.constant 0.000000e+00 : f32
    %6 = vector.broadcast %cst_5 : f32 to vector<8x25xf32>
    %7 = arith.maximumf %5, %6 : vector<8x25xf32>
    %c0_6 = arith.constant 0 : index
    %c0_7 = arith.constant 0 : index
    %8 = vector.load %arg4[%c0_6, %c0_7] : memref<25x16xf32, #tpu.memory_space<vmem>>, vector<25x16xf32>
    %cst_8 = arith.constant dense<0.000000e+00> : vector<8x16xf32>
    %9 = tpu.matmul %7, %8, %cst_8 {dimension_numbers = #tpu.dot_dimension_numbers<[1], [0], [0], [1], [0, 0, 1, 1], [], []>} : vector<8x25xf32>, vector<25x16xf32>, vector<8x16xf32> -> vector<8x16xf32>
    %c0_9 = arith.constant 0 : index
    %c0_10 = arith.constant 0 : index
    %10 = vector.load %arg5[%c0_9, %c0_10] : memref<1x16xf32, #tpu.memory_space<vmem>>, vector<1x16xf32>
    %11 = vector.broadcast %10 : vector<1x16xf32> to vector<8x16xf32>
    %12 = arith.addf %9, %11 : vector<8x16xf32>
    %cst_11 = arith.constant 0.000000e+00 : f32
    %13 = vector.broadcast %cst_11 : f32 to vector<8x16xf32>
    %14 = arith.maximumf %12, %13 : vector<8x16xf32>
    %c0_12 = arith.constant 0 : index
    %c0_13 = arith.constant 0 : index
    %15 = vector.load %arg6[%c0_12, %c0_13] : memref<16x10xf32, #tpu.memory_space<vmem>>, vector<16x10xf32>
    %cst_14 = arith.constant dense<0.000000e+00> : vector<8x10xf32>
    %16 = tpu.matmul %14, %15, %cst_14 {dimension_numbers = #tpu.dot_dimension_numbers<[1], [0], [0], [1], [0, 0, 1, 1], [], []>} : vector<8x16xf32>, vector<16x10xf32>, vector<8x10xf32> -> vector<8x10xf32>
    %c0_15 = arith.constant 0 : index
    %c0_16 = arith.constant 0 : index
    %17 = vector.load %arg7[%c0_15, %c0_16] : memref<1x10xf32, #tpu.memory_space<vmem>>, vector<1x10xf32>
    %18 = vector.broadcast %17 : vector<1x10xf32> to vector<8x10xf32>
    %19 = arith.addf %16, %18 : vector<8x10xf32>
    %c0_17 = arith.constant 0 : index
    %c0_18 = arith.constant 0 : index
    %20 = vector.load %arg8[%c0_17, %c0_18] : memref<8x10xf32, #tpu.memory_space<vmem>>, vector<8x10xf32>
    tpu.vector_store %arg8[%c0_17, %c0_18], %19 {strides = array<i32>} : memref<8x10xf32, #tpu.memory_space<vmem>>, vector<8x10xf32>,
    return
  }
  func.func @transform_0(%arg0: i32) -> (i32, i32) {
    %c0_i32 = arith.constant 0 : i32
    %c0_i32_0 = arith.constant 0 : i32
    return %arg0, %c0_i32 : i32, i32
  }
  func.func @transform_1(%arg0: i32) -> (i32, i32) {
    %c0_i32 = arith.constant 0 : i32
    %c0_i32_0 = arith.constant 0 : i32
    %c0_i32_1 = arith.constant 0 : i32
    return %c0_i32, %c0_i32_0 : i32, i32
  }
  func.func @transform_2(%arg0: i32) -> (i32, i32) {
    %c0_i32 = arith.constant 0 : i32
    %c0_i32_0 = arith.constant 0 : i32
    %c0_i32_1 = arith.constant 0 : i32
    return %c0_i32, %c0_i32_0 : i32, i32
  }
  func.func @transform_3(%arg0: i32) -> (i32, i32) {
    %c0_i32 = arith.constant 0 : i32
    %c0_i32_0 = arith.constant 0 : i32
    %c0_i32_1 = arith.constant 0 : i32
    return %c0_i32, %c0_i32_0 : i32, i32
  }
  func.func @transform_4(%arg0: i32) -> (i32, i32) {
    %c0_i32 = arith.constant 0 : i32
    %c0_i32_0 = arith.constant 0 : i32
    %c0_i32_1 = arith.constant 0 : i32
    return %c0_i32, %c0_i32_0 : i32, i32
  }
  func.func @transform_5(%arg0: i32) -> (i32, i32) {
    %c0_i32 = arith.constant 0 : i32
    %c0_i32_0 = arith.constant 0 : i32
    %c0_i32_1 = arith.constant 0 : i32
    return %c0_i32, %c0_i32_0 : i32, i32
  }
  func.func @transform_6(%arg0: i32) -> (i32, i32) {
    %c0_i32 = arith.constant 0 : i32
    %c0_i32_0 = arith.constant 0 : i32
    %c0_i32_1 = arith.constant 0 : i32
    return %c0_i32, %c0_i32_0 : i32, i32
  }
  func.func @transform_7(%arg0: i32) -> (i32, i32) {
    %c0_i32 = arith.constant 0 : i32
    %c0_i32_0 = arith.constant 0 : i32
    return %arg0, %c0_i32 : i32, i32
  }
}

</mosaic_0001>

<bundles_post_ra>
// kernel: tpu_custom_call.1
= control target key start
LH: loop header
LB: loop body
LE: loop exit
PB: predicated region body
PF: predicated region fallthrough
CT: control target
= control target key end

     0   :  { %12 = vsyncpa [#allocation3], 0  ;;  %s1788_s0 = inlined_call_operand.vmem [shape: f32[16,784], index: 0, kind: input, shape index: {}]   ;;  %s1789_s1 = inlined_call_operand.vmem [shape: f32[784,25], index: 1, kind: input, shape index: {}]   ;;  %s1790_s2 = inlined_call_operand.vmem [shape: f32[1,25], index: 2, kind: input, shape index: {}]   ;;  %s1791_s3 = inlined_call_operand.vmem [shape: f32[25,16], index: 3, kind: input, shape index: {}]   ;;  %s1792_s4 = inlined_call_operand.vmem [shape: f32[1,16], index: 4, kind: input, shape index: {}]   ;;  %s1793_s5 = inlined_call_operand.vmem [shape: f32[16,10], index: 5, kind: input, shape index: {}]   ;;  %s1794_s6 = inlined_call_operand.vmem [shape: f32[1,10], index: 6, kind: input, shape index: {}]   ;;  %s1795_s7 = inlined_call_operand.hbm [shape: f32[16,10], index: 7, kind: output, shape index: {}]  }
   0x1   :  { %14 = vsyncpa [#allocation3 + $0x1], 0  ;;  %s1341_s24 = smov 0   ;;  %s1343_s25 = smov 0  }
   0x2   :  { %s1345_s26 = smov 0   ;;  %s1347_s27 = smov 0  }
   0x3 LB: > { %s1362_s28 = sadd.s32 4294967295, %s1294_s27   ;;  %s921_s29 = sadd.s32 4294967294, %s1294_s27   ;;  %s1294_s27 = sphi %s1347_s27, %s1801_s27   ;;  %s1290_s26 = sphi %s1345_s26, %s1800_s26   ;;  %s1286_s25 = sphi %s1343_s25, %s1799_s25   ;;  %s1282_s24 = sphi %s1341_s24, %s1798_s24  }
   0x4   : > { %s1366_s30 = sadd.s32 1, %s1294_s27   ;;  %s179_s8 = sadd.s32 1, %s1290_s26 }
   0x5   : > { %s176_s9 = ssub.s32 %s1294_s27, %s1366_s30  ;;  %p189_p0 = scmp.ne.s32.totalorder %s1290_s26, %s1286_s25 }
   0x6   : > { %p177_p1 = scmp.eq.s32.totalorder %s176_s9, 0  ;;  %p190_p2 = scmp.eq.s32.totalorder %s1362_s28, 1 }
   0x7   : > { %p195_p3 = scmp.ne.s32.totalorder %s1286_s25, %s1282_s24  ;;  %p196_p4 = scmp.eq.s32.totalorder %s921_s29, 1 }
   0x8   : > { %s1377_s10 = scalar_select %p177_p1, %s1290_s26, %s179_s8  }
   0x9   : > { %p1379_p5 = por %p190_p2, %p189_p0  ;;  %p1383_p6 = por %p196_p4, %p195_p3 }
   0xa   : > { %p924_p7 = scmp.ge.s32.totalorder %s1294_s27, 1  ;;  %p240_p8 = scmp.lt.s32.totalorder %s1294_s27, 3 }
   0xc   : > { %p241_p9 = pnand %p924_p7, %p240_p8 }
   0xd   : > { %v300_v0 = vld [vmem:[%s1789_s1 + $0x80] sm:$0xff] (!%p241_p9)  ;;  %v301_v1 = vld [vmem:[%s1789_s1 + $0x88] sm:$0xff] (!%p241_p9)  ;;  %v302_v11 = vld [vmem:[%s1789_s1 + $0x90] sm:$0xff] (!%p241_p9)  ;;  %p272_p10 = scmp.lt.s32.totalorder (!%p241_p9), %s1362_s28, 1  ;;  %vm1297_vm0 = vmmov (!%p241_p9), 0   ;;  %vm389_vm1 = vcmask (!%p241_p9), 130048  }
   0xe   : > { %244 = sbr.rel (%p241_p9) target bundleno = 745 (0x2e9), region = 48  ;;  %v284_v2 = vld [vmem:[%s1789_s1] sm:$0xff] (!%p241_p9)  ;;  %v1079_v3 = vpack.c.bf16 (!%p241_p9), %v301_v1, %v300_v0  ;;  %v285_v4 = vld [vmem:[%s1789_s1 + $0x8] sm:$0xff] (!%p241_p9)  ;;  %v303_v13 = vld [vmem:[%s1789_s1 + $0x98] sm:$0xff] (!%p241_p9)  ;;  %vm689_vm2 = vcmask (!%p241_p9), 1040384   ;;  %vm1299_vm3 = vmmov (!%p241_p9), 1  }
   0xf   : > { %v332_v5 = vld [vmem:[%s1789_s1 + $0x180] sm:$0xff] (!%p241_p9)  ;;  %v333_v6 = vld [vmem:[%s1789_s1 + $0x188] sm:$0xff] (!%p241_p9)  ;;  %v1081_v7 = vpack.c.bf16 (!%p241_p9), %v285_v4, %v284_v2  ;;  %v286_v14 = vld [vmem:[%s1789_s1 + $0x10] sm:$0xff] (!%p241_p9)  ;;  %v1083_v16 = vpack.c.bf16 (!%p241_p9), %v303_v13, %v302_v11  ;;  %vm685_vm5 = vcmask (!%p241_p9), 203776   ;;  %s269_s16 = sand.u32 (!%p241_p9), 1, %s1286_s25   ;;  %s935_s20 = sshll.u32 (!%p241_p9), %s1362_s28, 7 }
  0x10   : > { %v1111_v8 = vpack.c.bf16 (!%p241_p9), %v333_v6, %v332_v5  ;;  %v316_v9 = vld [vmem:[%s1789_s1 + $0x100] sm:$0xff] (!%p241_p9)  ;;  %v317_v10 = vld [vmem:[%s1789_s1 + $0x108] sm:$0xff] (!%p241_p9)  ;;  %1080 = vmatprep.subr.bf16.mxu0 (!%p241_p9), %v1079_v3  ;;  %v287_v15 = vld [vmem:[%s1789_s1 + $0x18] sm:$0xff] (!%p241_p9)  ;;  %s925_s18 = sshll.u32 (!%p241_p9), %s269_s16, 3  ;;  %vm846_vm6 = vcmask (!%p241_p9), 80896   ;;  %s849_s8 = scalar_lea.sflag (!%p241_p9), [#allocation3], %s269_s16 }
  0x11   : > { %v1113_v12 = vpack.c.bf16 (!%p241_p9), %v317_v10, %v316_v9  ;;  %1082 = vmatpush3.bf16.msra.mxu0 (!%p241_p9), %v1081_v7  ;;  %v1085_v17 = vpack.c.bf16 (!%p241_p9), %v287_v15, %v286_v14  ;;  %v334_v18 = vld [vmem:[%s1789_s1 + $0x190] sm:$0xff] (!%p241_p9)  ;;  %v335_v19 = vld [vmem:[%s1789_s1 + $0x198] sm:$0xff] (!%p241_p9)  ;;  %v304_v23 = vld [vmem:[%s1789_s1 + $0xa0] sm:$0xff] (!%p241_p9)  ;;  %s271_s21 = scalar_lea.vmem (!%p241_p9), [#allocation2], %s925_s18 }
  0x12   : > { %1112 = vmatprep.subr.bf16.mxu1 (!%p241_p9), %v1111_v8  ;;  %v318_v20 = vld [vmem:[%s1789_s1 + $0x110] sm:$0xff] (!%p241_p9)  ;;  %v1115_v21 = vpack.c.bf16 (!%p241_p9), %v335_v19, %v334_v18  ;;  %v319_v22 = vld [vmem:[%s1789_s1 + $0x118] sm:$0xff] (!%p241_p9)  ;;  %v305_v24 = vld [vmem:[%s1789_s1 + $0xa8] sm:$0xff] (!%p241_p9)  ;;  %1084 = vmatprep.subr.bf16.mxu0 (!%p241_p9), %v1083_v16 }
  0x13   : > { %1114 = vmatpush3.bf16.msra.mxu1 (!%p241_p9), %v1113_v12  ;;  %v1117_v25 = vpack.c.bf16 (!%p241_p9), %v319_v22, %v318_v20  ;;  %v1087_v26 = vpack.c.bf16 (!%p241_p9), %v305_v24, %v304_v23  ;;  %v288_v27 = vld [vmem:[%s1789_s1 + $0x20] sm:$0xff] (!%p241_p9)  ;;  %v289_v28 = vld [vmem:[%s1789_s1 + $0x28] sm:$0xff] (!%p241_p9)  ;;  %v306_v35 = vld [vmem:[%s1789_s1 + $0xb0] sm:$0xff] (!%p241_p9) }
  0x14   : > { %v336_v29 = vld [vmem:[%s1789_s1 + $0x1a0] sm:$0xff] (!%p241_p9)  ;;  %1116 = vmatprep.subr.bf16.mxu1 (!%p241_p9), %v1115_v21  ;;  %v337_v30 = vld [vmem:[%s1789_s1 + $0x1a8] sm:$0xff] (!%p241_p9)  ;;  %v1089_v33 = vpack.c.bf16 (!%p241_p9), %v289_v28, %v288_v27  ;;  %v307_v36 = vld [vmem:[%s1789_s1 + $0xb8] sm:$0xff] (!%p241_p9) }
  0x15   : > { %v320_v31 = vld [vmem:[%s1789_s1 + $0x120] sm:$0xff]  ;;  %v321_v32 = vld [vmem:[%s1789_s1 + $0x128] sm:$0xff]  ;;  %1086 = vmatpush3.bf16.msra.mxu0 %v1085_v17  ;;  %v1119_v34 = vpack.c.bf16 %v337_v30, %v336_v29  ;;  %v290_v37 = vld [vmem:[%s1789_s1 + $0x30] sm:$0xff]  ;;  %v1091_v39 = vpack.c.bf16 %v307_v36, %v306_v35  ;;  %s1483_s17 = scalar_select %p272_p10, %s1362_s28, 1 }
  0x16   : > { %1088 = vmatprep.subr.bf16.mxu0 %v1087_v26  ;;  %v1121_v38 = vpack.c.bf16 %v321_v32, %v320_v31  ;;  %v291_v40 = vld [vmem:[%s1789_s1 + $0x38] sm:$0xff]  ;;  %v338_v41 = vld [vmem:[%s1789_s1 + $0x1b0] sm:$0xff]  ;;  %v308_v46 = vld [vmem:[%s1789_s1 + $0xc0] sm:$0xff]  ;;  %s1300_s28 = smov [#allocation2]  }
  0x17   : > { %1118 = vmatpush3.bf16.msra.mxu1 %v1117_v25  ;;  %v339_v42 = vld [vmem:[%s1789_s1 + $0x1b8] sm:$0xff]  ;;  %v322_v44 = vld [vmem:[%s1789_s1 + $0x130] sm:$0xff]  ;;  %v309_v47 = vld [vmem:[%s1789_s1 + $0xc8] sm:$0xff]  ;;  %v1093_v48 = vpack.c.bf16 %v291_v40, %v290_v37  ;;  %s1188_s23 = smul.u32 56, %s1483_s17  ;;  %s1236_s13 = sshll.u32 %s1300_s28, 4  ;;  %s1237_s13 = int_to_ptr.vmem [resolvable:$false] %s1236_s13 }
  0x18   : > { %1120 = vmatprep.subr.bf16.mxu1 %v1119_v34  ;;  %v1123_v43 = vpack.c.bf16 %v339_v42, %v338_v41  ;;  %v323_v45 = vld [vmem:[%s1789_s1 + $0x138] sm:$0xff]  ;;  %v340_v49 = vld [vmem:[%s1789_s1 + $0x1c0] sm:$0xff]  ;;  %v341_v50 = vld [vmem:[%s1789_s1 + $0x1c8] sm:$0xff]  ;;  %v1095_v52 = vpack.c.bf16 %v309_v47, %v308_v46  ;;  %s1238_s14 = scalar_lea.vmem %s1237_s13, 256 }
  0x19   : > { %1090 = vmatpush3.bf16.msra.mxu0 %v1089_v33  ;;  %v1125_v51 = vpack.c.bf16 %v323_v45, %v322_v44  ;;  %v292_v53 = vld [vmem:[%s1789_s1 + $0x40] sm:$0xff]  ;;  %v293_v54 = vld [vmem:[%s1789_s1 + $0x48] sm:$0xff]  ;;  %v1127_v56 = vpack.c.bf16 %v341_v50, %v340_v49  ;;  %v310_v58 = vld [vmem:[%s1789_s1 + $0xd0] sm:$0xff]  ;;  %s1540_s15 = scalar_lea.vmem %s1788_s0, %s1188_s23  ;;  %v1296_v50 = vmov 0.0|0.0   ;;  %s1746_s23 = scalar_lea.hbm %s1795_s7, %s935_s20 }
  0x1a   : > { %1092 = vmatprep.subr.bf16.mxu0 %v1091_v39  ;;  %v324_v55 = vld [vmem:[%s1789_s1 + $0x140] sm:$0xff]  ;;  %v325_v57 = vld [vmem:[%s1789_s1 + $0x148] sm:$0xff]  ;;  %v311_v59 = vld [vmem:[%s1789_s1 + $0xd8] sm:$0xff]  ;;  %v1097_v62 = vpack.c.bf16 %v293_v54, %v292_v53 }
  0x1b   : > { %1122 = vmatpush3.bf16.msra.mxu1 %v1121_v38  ;;  %v342_v60 = vld [vmem:[%s1789_s1 + $0x1d0] sm:$0xff]  ;;  %v343_v61 = vld [vmem:[%s1789_s1 + $0x1d8] sm:$0xff]  ;;  %v1129_v63 = vpack.c.bf16 %v325_v57, %v324_v55  ;;  %v1099_v0 = vpack.c.bf16 %v311_v59, %v310_v58  ;;  %v312_v6 = vld [vmem:[%s1789_s1 + $0xe0] sm:$0xff] }
  0x1c   : > { %1124 = vmatprep.subr.bf16.mxu1 %v1123_v43  ;;  %v294_v1 = vld [vmem:[%s1789_s1 + $0x50] sm:$0xff]  ;;  %v295_v2 = vld [vmem:[%s1789_s1 + $0x58] sm:$0xff]  ;;  %v1131_v4 = vpack.c.bf16 %v343_v61, %v342_v60  ;;  %v313_v7 = vld [vmem:[%s1789_s1 + $0xe8] sm:$0xff]  ;;  %v1298_v60 = vmov 0.0  }
  0x1d   : > { %1094 = vmatpush3.bf16.msra.mxu0 %v1093_v48  ;;  %v326_v3 = vld [vmem:[%s1789_s1 + $0x150] sm:$0xff]  ;;  %v327_v5 = vld [vmem:[%s1789_s1 + $0x158] sm:$0xff]  ;;  %v344_v8 = vld [vmem:[%s1789_s1 + $0x1e0] sm:$0xff]  ;;  %v1101_v10 = vpack.c.bf16 %v295_v2, %v294_v1  ;;  %v1103_v14 = vpack.c.bf16 %v313_v7, %v312_v6 }
  0x1e   : > { %1096 = vmatprep.subr.bf16.mxu0 %v1095_v52  ;;  %v345_v9 = vld [vmem:[%s1789_s1 + $0x1e8] sm:$0xff]  ;;  %v296_v11 = vld [vmem:[%s1789_s1 + $0x60] sm:$0xff]  ;;  %v1133_v13 = vpack.c.bf16 %v327_v5, %v326_v3  ;;  %v314_v19 = vld [vmem:[%s1789_s1 + $0xf0] sm:$0xff] }
  0x1f   : > { %1126 = vmatpush3.bf16.msra.mxu1 %v1125_v51  ;;  %v278_v12 = vld [vmem:[%s1540_s15 + $0x8] sm:$0xff]  ;;  %v328_v16 = vld [vmem:[%s1789_s1 + $0x160] sm:$0xff]  ;;  %v1135_v18 = vpack.c.bf16 %v345_v9, %v344_v8  ;;  %v315_v20 = vld [vmem:[%s1789_s1 + $0xf8] sm:$0xff] }
  0x20   : > { %1128 = vmatprep.subr.bf16.mxu1 %v1127_v56  ;;  %v297_v15 = vld [vmem:[%s1789_s1 + $0x68] sm:$0xff]  ;;  %457 = vmatprep.mubr.f32.mxu0 %v278_v12  ;;  %v280_v21 = vld [vmem:[%s1540_s15 + $0x18] sm:$0xff]  ;;  %v346_v22 = vld [vmem:[%s1789_s1 + $0x1f0] sm:$0xff]  ;;  %v1107_v26 = vpack.c.bf16 %v315_v20, %v314_v19 }
  0x21   : > { %1098 = vmatpush3.bf16.msra.mxu0 %v1097_v62  ;;  %v329_v17 = vld [vmem:[%s1789_s1 + $0x168] sm:$0xff]  ;;  %v347_v23 = vld [vmem:[%s1789_s1 + $0x1f8] sm:$0xff]  ;;  %527 = vmatprep.mubr.f32.mxu1 %v280_v21  ;;  %v1105_v24 = vpack.c.bf16 %v297_v15, %v296_v11  ;;  %v298_v27 = vld [vmem:[%s1789_s1 + $0x70] sm:$0xff] }
  0x22   : > { %1100 = vmatprep.subr.bf16.mxu0 %v1099_v0  ;;  %v1137_v25 = vpack.c.bf16 %v329_v17, %v328_v16  ;;  %v299_v28 = vld [vmem:[%s1789_s1 + $0x78] sm:$0xff]  ;;  %v330_v29 = vld [vmem:[%s1789_s1 + $0x170] sm:$0xff]  ;;  %v1139_v30 = vpack.c.bf16 %v347_v23, %v346_v22  ;;  %v364_v32 = vld [vmem:[%s1789_s1 + $0x280] sm:$0xff] }
  0x23   : > { %1130 = vmatpush3.bf16.msra.mxu1 %v1129_v63  ;;  %v331_v31 = vld [vmem:[%s1789_s1 + $0x178] sm:$0xff]  ;;  %v365_v33 = vld [vmem:[%s1789_s1 + $0x288] sm:$0xff]  ;;  %v1109_v34 = vpack.c.bf16 %v299_v28, %v298_v27  ;;  %v348_v37 = vld [vmem:[%s1789_s1 + $0x200] sm:$0xff] }
  0x24   : > { %1132 = vmatprep.subr.bf16.mxu1 %v1131_v4  ;;  %v1141_v35 = vpack.c.bf16 %v331_v31, %v330_v29  ;;  %v1143_v36 = vpack.c.bf16 %v365_v33, %v364_v32  ;;  %v349_v38 = vld [vmem:[%s1789_s1 + $0x208] sm:$0xff]  ;;  %v366_v39 = vld [vmem:[%s1789_s1 + $0x290] sm:$0xff]  ;;  %v367_v40 = vld [vmem:[%s1789_s1 + $0x298] sm:$0xff] }
  0x25   : > { %1102 = vmatpush3.bf16.msra.mxu0 %v1101_v10  ;;  %v277_v41 = vld [vmem:[%s1540_s15] sm:$0xff]  ;;  %v1145_v42 = vpack.c.bf16 %v349_v38, %v348_v37  ;;  %v279_v43 = vld [vmem:[%s1540_s15 + $0x10] sm:$0xff]  ;;  %v1147_v45 = vpack.c.bf16 %v367_v40, %v366_v39  ;;  %v351_v46 = vld [vmem:[%s1789_s1 + $0x218] sm:$0xff] }
  0x26   : > { %1104 = vmatprep.subr.bf16.mxu0 %v1103_v14  ;;  %v350_v44 = vld [vmem:[%s1789_s1 + $0x210] sm:$0xff]  ;;  %v368_v47 = vld [vmem:[%s1789_s1 + $0x2a0] sm:$0xff]  ;;  %v369_v48 = vld [vmem:[%s1789_s1 + $0x2a8] sm:$0xff] }
  0x27   : > { %1134 = vmatpush3.bf16.msra.mxu1 %v1133_v13  ;;  %v282_v49 = vld [vmem:[%s1540_s15 + $0x28] sm:$0xff]  ;;  %v380_v51 = vld [vmem:[%s1789_s1 + $0x300] sm:$0xff]  ;;  %v1149_v54 = vpack.c.bf16 %v351_v46, %v350_v44  ;;  %v1151_v55 = vpack.c.bf16 %v369_v48, %v368_v47  ;;  %v370_v58 = vld [vmem:[%s1789_s1 + $0x2b0] sm:$0xff] }
  0x28   : > { %1136 = vmatprep.subr.bf16.mxu1 %v1135_v18  ;;  %v381_v52 = vld [vmem:[%s1789_s1 + $0x308] sm:$0xff]  ;;  %v352_v56 = vld [vmem:[%s1789_s1 + $0x220] sm:$0xff]  ;;  %v371_v59 = vld [vmem:[%s1789_s1 + $0x2b8] sm:$0xff] }
  0x29   : > { %1106 = vmatpush3.bf16.msra.mxu0 %v1105_v24  ;;  %v1176_v53 = vpack.c.bf16 %v381_v52, %v380_v51  ;;  %v353_v57 = vld [vmem:[%s1789_s1 + $0x228] sm:$0xff]  ;;  %v283_v61 = vld [vmem:[%s1540_s15 + $0x30] sm:$0xff]  ;;  %v1155_v63 = vpack.c.bf16 %v371_v59, %v370_v58  ;;  %v355_v1 = vld [vmem:[%s1789_s1 + $0x238] sm:$0xff] }
  0x2a   : > { %1108 = vmatprep.subr.bf16.mxu0 %v1107_v26  ;;  %v1153_v62 = vpack.c.bf16 %v353_v57, %v352_v56  ;;  %v354_v0 = vld [vmem:[%s1789_s1 + $0x230] sm:$0xff]  ;;  %v372_v2 = vld [vmem:[%s1789_s1 + $0x2c0] sm:$0xff]  ;;  %v373_v3 = vld [vmem:[%s1789_s1 + $0x2c8] sm:$0xff] }
  0x2b   : > { %1138 = vmatpush3.bf16.msra.mxu1 %v1137_v25  ;;  %v1157_v4 = vpack.c.bf16 %v355_v1, %v354_v0  ;;  %v1159_v5 = vpack.c.bf16 %v373_v3, %v372_v2  ;;  %v356_v6 = vld [vmem:[%s1789_s1 + $0x240] sm:$0xff]  ;;  %v357_v7 = vld [vmem:[%s1789_s1 + $0x248] sm:$0xff]  ;;  %v374_v8 = vld [vmem:[%s1789_s1 + $0x2d0] sm:$0xff] }
  0x2c   : > { %1140 = vmatprep.subr.bf16.mxu1 %v1139_v30  ;;  %v375_v9 = vld [vmem:[%s1789_s1 + $0x2d8] sm:$0xff]  ;;  %v1161_v10 = vpack.c.bf16 %v357_v7, %v356_v6  ;;  %v358_v12 = vld [vmem:[%s1789_s1 + $0x250] sm:$0xff]  ;;  %v376_v14 = vld [vmem:[%s1789_s1 + $0x2e0] sm:$0xff] }
  0x2d   : > { %1110 = vmatpush3.bf16.msra.mxu0 %v1109_v34  ;;  %v1163_v11 = vpack.c.bf16 %v375_v9, %v374_v8  ;;  %v359_v13 = vld [vmem:[%s1789_s1 + $0x258] sm:$0xff]  ;;  %v377_v15 = vld [vmem:[%s1789_s1 + $0x2e8] sm:$0xff]  ;;  %v360_v18 = vld [vmem:[%s1789_s1 + $0x260] sm:$0xff] }
  0x2e   : > { %1144 = vmatprep.subr.bf16.mxu0 %v1143_v36  ;;  %v1165_v16 = vpack.c.bf16 %v359_v13, %v358_v12  ;;  %v1167_v17 = vpack.c.bf16 %v377_v15, %v376_v14  ;;  %v361_v19 = vld [vmem:[%s1789_s1 + $0x268] sm:$0xff]  ;;  %v378_v20 = vld [vmem:[%s1789_s1 + $0x2f0] sm:$0xff]  ;;  %v379_v21 = vld [vmem:[%s1789_s1 + $0x2f8] sm:$0xff] }
  0x2f   : > { %1142 = vmatpush3.bf16.msra.mxu1 %v1141_v35  ;;  %v1169_v22 = vpack.c.bf16 %v361_v19, %v360_v18  ;;  %v1171_v23 = vpack.c.bf16 %v379_v21, %v378_v20  ;;  %v362_v24 = vld [vmem:[%s1789_s1 + $0x270] sm:$0xff]  ;;  %v363_v25 = vld [vmem:[%s1789_s1 + $0x278] sm:$0xff]  ;;  %v281_v27 = vld [vmem:[%s1540_s15 + $0x20] sm:$0xff]  ;;  %s862_s15 = sshll.u32 %s271_s21, 4  ;;  %s1748_s15 = int_to_ptr.vmem [resolvable:$true] %s862_s15 }
  0x30   : > { %1175 = vmatprep.subr.bf16.mxu1 %v1296_v50  ;;  %458 = vmatmul.mubr.f32.vlgmr.msra.gmra.mrb[0].mxu0 %v277_v41  ;;  %v1173_v26 = vpack.c.bf16 %v363_v25, %v362_v24  ;;  %v674_v28 = vld [vmem:[%s1791_s3] sm:$0xff]  ;;  %v675_v29 = vld [vmem:[%s1791_s3 + $0x8] sm:$0xff]  ;;  %v676_v31 = vld [vmem:[%s1791_s3 + $0x10] sm:$0xff]  ;;  %s1232_s9 = scalar_lea.vmem %s1748_s15, 128  ;;  %p1239_p0 = scmp.lt.s32.totalorder %s1748_s15, %s1237_s13 }
  0x31   : > { %1146 = vmatpush3.bf16.msra.mxu0 %v1145_v42  ;;  %597 = vmatprep.mubr.f32.mxu0 %v282_v49  ;;  %v1179_v30 = vpack.c.bf16 %v675_v29, %v674_v28  ;;  %v677_v32 = vld [vmem:[%s1791_s3 + $0x18] sm:$0x1]  ;;  %vm1183_vm4 = vmpackc.low %vm689_vm2, %vm1299_vm3  ;;  %v927_v35 = vld [vmem:[%s1790_s2] ss:$0 sm:$0xff]  ;;  %p1233_p11 = scmp.ne.s32.totalorder %s1748_s15, %s1232_s9  ;;  %p1240_p1 = scmp.lt.s32.totalorder %s1238_s14, %s1232_s9 }
  0x32   : > { %528 = vmatmul.mubr.f32.vlgmr.msra.gmra.mrb[0].mxu1 %v279_v43  ;;  %1148 = vmatprep.subr.bf16.mxu0 %v1147_v45  ;;  %v1182_v33 = vpack.c.bf16 %v677_v32, %v676_v31  ;;  %v764_v51 = vld [vmem:[%s1793_s5] sm:$0xff]  ;;  %v765_v52 = vld [vmem:[%s1793_s5 + $0x8] sm:$0xff] }
  0x33   : > { %1177 = vmatpush3.bf16.msra.mxu1 %v1176_v53  ;;  %1058 = vmatprep.mubr.msk.f32.mxu1 %vm1297_vm0, %v1298_v60  ;;  %v1186_v53 = vpack.c.bf16 %v765_v52, %v764_v51  ;;  %v932_v59 = vld [vmem:[%s1794_s6] ss:$0 sm:$0xff]  ;;  %p1234_p12 = pnand %p1233_p11, %p1379_p5  ;;  %p1241_p2 = por %p1240_p1, %p1239_p0 }
  0x34   : > { %1178 = vmatprep.subr.bf16.mxu1 %v1296_v50 }
  0x35   : > { %1150 = vmatpush3.bf16.msra.mxu0 %v1149_v54  ;;  %v929_v54 = vld [vmem:[%s1792_s4] ss:$0 sm:$0xff]  ;;  %p1235_p13 = pneg %p1234_p12 }
  0x36   : > { %1152 = vmatprep.subr.bf16.mxu0 %v1151_v55  ;;  %1059 = vmatmul.mubr.msk.f32.vlgmr.msra.gmra.mrb[2].mxu1 %vm389_vm1, %v283_v61 }
  0x37   : > { %1069 = vmatprep.mubr.msk.f32.mxu1 %vm1297_vm0, %v1298_v60  ;;  %1180 = vmatpush3.bf16.msra.mxu1 %v1179_v30  ;;  %p1242_p3 = pnand %p1241_p2, %p1235_p13 }
  0x38   : > { %1181 = vmatprep.subr.bf16.mxu1 %v1296_v50 }
  0x39   : > { %1154 = vmatpush3.bf16.msra.mxu0 %v1153_v62 }
  0x3a   : > { %1156 = vmatprep.subr.bf16.mxu0 %v1155_v63 }
  0x3b   : > { %1184 = vmatpush3.bf16.msk.msra.mxu1 %vm1183_vm4, %v1182_v33 }
  0x3c   : > { %1185 = vmatprep.subr.bf16.mxu1 %v1296_v50 }
  0x3d   : > { %1158 = vmatpush3.bf16.msra.mxu0 %v1157_v4 }
  0x3e   : > { %1160 = vmatprep.subr.bf16.mxu0 %v1159_v5 }
  0x41   : > { %1162 = vmatpush3.bf16.msra.mxu0 %v1161_v10 }
  0x42   : > { %1164 = vmatprep.subr.bf16.mxu0 %v1163_v11 }
  0x45   : > { %1166 = vmatpush3.bf16.msra.mxu0 %v1165_v16 }
  0x46   : > { %1168 = vmatprep.subr.bf16.mxu0 %v1167_v17 }
  0x49   : > { %1170 = vmatpush3.bf16.msra.mxu0 %v1169_v22 }
  0x4a   : > { %1172 = vmatprep.subr.bf16.mxu0 %v1171_v23 }
  0x4d   : > { %1174 = vmatpush3.bf16.msra.mxu0 %v1173_v26 }
  0x50   : > { %598 = vmatmul.mubr.f32.vlgmr.msra.gmra.mrb[2].mxu0 %v281_v27 }
 0x103   : > { %v970_v34 = vpop.f32.mrb[0].mxu0 }
 0x104   : > { %v971_v36 = vpop.f32.mrb[1].mxu0 }
 0x105   : > { %v1005_v37 = vpop.f32.mrb[0].mxu1  ;;  %v972_v38 = vadd.f32 %v971_v36, %v970_v34 }
 0x106   : > { %v1006_v39 = vpop.f32.mrb[1].mxu1 }
 0x107   : > { %v1007_v40 = vadd.f32 %v1006_v39, %v1005_v37  ;;  %v460_v41 = vadd.f32 %v972_v38, %v927_v35 }
 0x109   : > { %v530_v42 = vadd.f32 %v1007_v40, %v460_v41  ;;  %v669_v43 = vpop.f32.mrb[2].mxu1 }
 0x10a   : > { %v1060_v44 = vpop.f32.mrb[3].mxu1 }
 0x123   : > { %v1040_v45 = vpop.f32.mrb[2].mxu0 }
 0x124   : > { %v1041_v46 = vpop.f32.mrb[3].mxu0 }
 0x125   : > { %v1042_v47 = vadd.f32 %v1041_v46, %v1040_v45 }
 0x127   : > { %v600_v48 = vadd.f32 %v1042_v47, %v530_v42 }
 0x129   : > { %v670_v49 = vadd.f32 %v669_v43, %v600_v48 }
 0x12b   : > { %v673_v50 = vmax.f32 %v670_v49, 0.0 }
 0x12d   : > { %1070 = vmatmul.mubr.msk.f32.vlgmr.msra.gmra.mrb[4].mxu1 %vm685_vm5, %v673_v50 }
 0x12e   : > { %1076 = vmatprep.mubr.msk.f32.mxu1 %vm1297_vm0, %v1298_v60  ;;  %1187 = vmatpush3.bf16.msra.mxu1 %v1186_v53 }
 0x200   : > { %v759_v55 = vpop.f32.mrb[4].mxu1 }
 0x201   : > { %v760_v56 = vadd.f32 %v929_v54, %v759_v55  ;;  %v1071_v57 = vpop.f32.mrb[5].mxu1 }
 0x203   : > { %v763_v58 = vmax.f32 %v760_v56, 0.0 }
 0x205   : > { %1077 = vmatmul.mubr.msk.f32.vlgmr.msra.gmra.mrb[6].mxu1 %vm389_vm1, %v763_v58 }
 0x2d8   : > { %v842_v60 = vpop.f32.mrb[6].mxu1 }
 0x2d9   : > { %v843_v61 = vadd.f32 %v932_v59, %v842_v60  ;;  %v1078_v62 = vpop.f32.mrb[7].mxu1 }
 0x2db   : > { %847 = vst.msk [vmem:[%s271_s21] sm:$0xff] %vm846_vm6, %v843_v61 }
 0x2dc   : > { %1245 = shalt.err (!%p1242_p3)
}
 0x2dd   : > { %s1246_s16 = scalar_lea.hbm %s1746_s23, 128  ;;  %s1250_s17 = scalar_lea.hbm %s1795_s7, 256 }
 0x2de   : > { %p1247_p4 = scmp.ne.s32.totalorder %s1746_s23, %s1246_s16  ;;  %p1251_p9 = scmp.lt.u32.totalorder %s1746_s23, %s1795_s7 }
 0x2df   : > { %p1252_p10 = scmp.lt.u32.totalorder %s1250_s17, %s1246_s16  ;;  %p1254_p12 = scmp.lt.u32.totalorder %s1246_s16, %s1746_s23 }
 0x2e0   : > { %p1248_p7 = pnand %p1247_p4, %p1379_p5 }
 0x2e1   : > { %p1253_p11 = por %p1252_p10, %p1251_p9 }
 0x2e2   : > { %p1249_p8 = pneg %p1248_p7 }
 0x2e3   : > { %p1255_p13 = por %p1254_p12, %p1253_p11 }
 0x2e5   : > { %p1256_p0 = pnand %p1255_p13, %p1249_p8 }
 0x2e7   : > { %1259 = shalt.err (!%p1256_p0)
}
 0x2e8   : > { %1189 = dma.vmem_to_hbm [thread:$0]  (%p1379_p5), %s1748_s15, 128, %s1746_s23, %s849_s8  }
 0x2e9 PF: > { %p1195_p1 = scmp.ge.s32.totalorder %s1294_s27, 2  ;;  %s874_s22 = sand.u32 1, %s1282_s24  }
 0x2ea   : > { %s875_s29 = scalar_lea.sflag [#allocation3], %s874_s22 }
 0x2eb   : > { %p1192_p2 = pnand %p1195_p1, %p1383_p6 }
 0x2ed   : > { %1277 = dma.done.wait (!%p1192_p2), %s875_s29, 128  }
 0x2ee   : > { %1279 = vsyncadd (!%p1192_p2), %s875_s29, 4294967168  ;;  %p17_p3 = scmp.ge.s32.totalorder %s1366_s30, 4   ;;  %s1798_s24 = smov %s1286_s25 }
 0x2ef   : > { %s1799_s25 = smov %s1290_s26  ;;  %s1800_s26 = smov %s1377_s10 }
 0x2f0   : > { %s1801_s27 = smov %s1366_s30  ;;  %19 = sbr.rel (!%p17_p3) target bundleno = 3 (0x3), region = 83 }
 0x2f7   :  { %880 = vsyncpa [#allocation3], 1 }
 0x2f8   :  { %882 = vsyncpa [#allocation3 + $0x1], 1 }

</bundles_post_ra>
